<compile_context>
chip_gen: v6e
topology: v6e:2x2x1
jax: 0.10.0
libtpu: 0.0.40
codegen_flags: <defaults>
</compile_context>

<pallas_src>
import functools

import jax
import jax.numpy as jnp
from jax.experimental import pallas as pl
from jax.experimental.pallas import tpu as pltpu

_NEG_BIG = -1e30


def _round_up(x, m):
    return ((x + m - 1) // m) * m


def _choose_tile(n, tile_n):
    """Pick a sublane-aligned row tile.

    Prefers (a) grid >= 2 when N allows (v7x has two TensorCores and the grid
    axis is "parallel"), and (b) a tile that divides N exactly so no padded
    rows / wrapper slice copy are needed (v5e HBM bandwidth is the lowest).
    """
    half = _round_up(max((n + 1) // 2, 1), 8)
    cap = max(8, min(tile_n - tile_n % 8, half))
    if n % cap == 0:
        return cap
    cand = cap
    while cand >= 8:
        if cand % 8 == 0 and n % cand == 0:
            return cand
        cand //= 2
    return cap  # fall back to padding the last tile


def _embed_kernel(idx_ref, table_ref, logits_ref, *, vocab_size):
    # idx_ref: (TN, 1) int32   table_ref: (Cp, Cp) f32 (pad cols pre-biased)
    # logits_ref: (TN, C) f32
    tn = idx_ref.shape[0]
    cp = table_ref.shape[1]
    idx = idx_ref[...]                                         # (TN, 1)
    col = jax.lax.broadcasted_iota(jnp.int32, (tn, cp), 1)     # (TN, Cp)
    onehot = (col == idx).astype(table_ref.dtype)              # (TN, Cp)
    logits = jnp.dot(onehot, table_ref[...],
                     preferred_element_type=jnp.float32)       # (TN, Cp)
    logits_ref[...] = logits[:, :vocab_size].astype(logits_ref.dtype)


def _embed_loss_kernel(idx_ref, tgt_ref, table_ref, logits_ref, losssum_ref, *,
                       vocab_size, num_valid_rows, tile_rows):
    # idx_ref, tgt_ref: (TN, 1) int32   table_ref: (Cp, Cp) f32
    # logits_ref: (TN, C) f32           losssum_ref: (1, 8, 128) f32 per-tile sum
    tn = idx_ref.shape[0]
    cp = table_ref.shape[1]
    idx = idx_ref[...]
    tgt = tgt_ref[...]
    col = jax.lax.broadcasted_iota(jnp.int32, (tn, cp), 1)

    # Embedding gather as one-hot @ table on the MXU (Cp = 128 -> native tile).
    onehot = (col == idx).astype(table_ref.dtype)
    logits = jnp.dot(onehot, table_ref[...],
                     preferred_element_type=jnp.float32)       # (TN, Cp)
    logits_ref[...] = logits[:, :vocab_size].astype(logits_ref.dtype)

    # Stabilized cross-entropy.  Padded vocab columns hold -1e30 straight from
    # the pre-biased table, so no extra where() mask is needed here.
    m = jnp.max(logits, axis=-1, keepdims=True)                # (TN, 1)
    lse = m + jnp.log(jnp.sum(jnp.exp(logits - m), axis=-1, keepdims=True))
    onehot_tgt = (col == tgt).astype(jnp.float32)
    picked = jnp.sum(onehot_tgt * logits, axis=-1, keepdims=True)
    nll = lse - picked                                         # (TN, 1)

    # Mask padded rows (global row index >= true N) and reduce to one scalar.
    row = (pl.program_id(0) * tile_rows
           + jax.lax.broadcasted_iota(jnp.int32, (tn, 1), 0))
    valid = (row < num_valid_rows).astype(jnp.float32)
    tile_sum = jnp.sum(nll * valid)
    losssum_ref[...] = jnp.full(losssum_ref.shape, tile_sum, dtype=jnp.float32)


def _bigram_forward(idx_flat, table_padded, vocab_size, tgt_flat=None,
                    tile_n=2048):
    n = int(idx_flat.shape[0])
    c = vocab_size
    cp = table_padded.shape[0]

    tn = _choose_tile(n, tile_n)
    n_pad = _round_up(n, tn)
    grid = n_pad // tn
    pad = n_pad - n

    idx_p = idx_flat.astype(jnp.int32)
    if pad:
        idx_p = jnp.pad(idx_p, (0, pad))
    idx_p = idx_p.reshape(n_pad, 1)

    compiler_params = pltpu.CompilerParams(
        dimension_semantics=("parallel",),     # shard tiles across TCs on v7x
        vmem_limit_bytes=32 * 1024 * 1024,
    )

    if tgt_flat is None:
        # Inference specialization: no target DMA, no loss output.
        logits = pl.pallas_call(
            functools.partial(_embed_kernel, vocab_size=c),
            out_shape=jax.ShapeDtypeStruct((n_pad, c), jnp.float32),
            grid_spec=pltpu.PrefetchScalarGridSpec(
                num_scalar_prefetch=0,
                grid=(grid,),
                in_specs=[
                    pl.BlockSpec((tn, 1), lambda i: (i, 0)),    # idx tile
                    pl.BlockSpec((cp, cp), lambda i: (0, 0)),   # resident table
                ],
                out_specs=pl.BlockSpec((tn, c), lambda i: (i, 0)),
            ),
            compiler_params=compiler_params,
        )(idx_p, table_padded)
        if pad:
            logits = logits[:n]
        return logits, None

    tgt_p = tgt_flat.astype(jnp.int32)
    if pad:
        tgt_p = jnp.pad(tgt_p, (0, pad))
    tgt_p = tgt_p.reshape(n_pad, 1)

    logits, loss_part = pl.pallas_call(
        functools.partial(_embed_loss_kernel, vocab_size=c,
                          num_valid_rows=n, tile_rows=tn),
        out_shape=(
            jax.ShapeDtypeStruct((n_pad, c), jnp.float32),
            jax.ShapeDtypeStruct((grid, 8, 128), jnp.float32),  # per-tile sums
        ),
        grid_spec=pltpu.PrefetchScalarGridSpec(
            num_scalar_prefetch=0,
            grid=(grid,),
            in_specs=[
                pl.BlockSpec((tn, 1), lambda i: (i, 0)),        # idx tile
                pl.BlockSpec((tn, 1), lambda i: (i, 0)),        # target tile
                pl.BlockSpec((cp, cp), lambda i: (0, 0)),       # resident table
            ],
            out_specs=[
                pl.BlockSpec((tn, c), lambda i: (i, 0)),        # logits tile
                pl.BlockSpec((1, 8, 128), lambda i: (i, 0, 0)), # tile loss sum
            ],
        ),
        compiler_params=compiler_params,
    )(idx_p, tgt_p, table_padded)

    if pad:
        logits = logits[:n]
    # Sum of per-tile partial sums over the true N rows, mean reduction.
    loss = jnp.sum(loss_part[:, 0, 0]) / jnp.float32(n)
    return logits, loss


class BigramLanguageModel:
    """JAX/Pallas port of the PyTorch BigramLanguageModel (forward pass only)."""

    def __init__(self, vocab_size, key, tile_n=2048):
        self.vocab_size = vocab_size
        self.tile_n = tile_n
        # nn.Embedding default init: N(0, 1)
        table = jax.random.normal(key, (vocab_size, vocab_size),
                                  dtype=jnp.float32)
        self.token_embedding_table = table
        # Zero-pad both vocab axes to a multiple of 128; pre-bias all padded
        # entries to -1e30 so the in-kernel lse ignores them for free.  The
        # padded columns are never stored to HBM (true-width logits output).
        cp = _round_up(vocab_size, 128)
        self._table_padded = jnp.full((cp, cp), _NEG_BIG, jnp.float32).at[
            :vocab_size, :vocab_size].set(table)

    def forward(self, idx, targets=None):
        B, T = idx.shape
        C = self.vocab_size
        n = B * T
        idx_flat = idx.reshape(n)
        if targets is None:
            logits_flat, _ = _bigram_forward(
                idx_flat, self._table_padded, C, tgt_flat=None,
                tile_n=self.tile_n)
            # PyTorch returns (B, T, C) logits when no targets are given.
            return logits_flat.reshape(B, T, C), None
        logits_flat, loss = _bigram_forward(
            idx_flat, self._table_padded, C, tgt_flat=targets.reshape(n),
            tile_n=self.tile_n)
        # PyTorch returns the flattened (B*T, C) view when targets are given.
        return logits_flat, loss

    # TODO(synk): generate() uses torch.multinomial sampling in a host-side
    # autoregressive loop; not a hot kernel path, so it is not implemented in Pallas.


if __name__ == "__main__":
    key = jax.random.PRNGKey(0)
    k_tab, k_idx, k_tgt, k_idx2, k_tgt2 = jax.random.split(key, 5)

    vocab_size = 65   # tinyshakespeare-like char vocab
    B, T = 2, 8

    model = BigramLanguageModel(vocab_size, k_tab)
    idx = jax.random.randint(k_idx, (B, T), 0, vocab_size, dtype=jnp.int32)
    targets = jax.random.randint(k_tgt, (B, T), 0, vocab_size, dtype=jnp.int32)

    # Run the kernels (with and without targets).
    logits_nt, loss_nt = model.forward(idx, None)
    logits, loss = model.forward(idx, targets)
    jax.block_until_ready((logits_nt, logits, loss))

    # Pure-JAX reference.
    def ref_forward(table, idx_flat, tgt_flat):
        ref_logits = table[idx_flat]                                   # (N, C)
        lse = jax.scipy.special.logsumexp(ref_logits, axis=-1)
        picked = jnp.take_along_axis(ref_logits, tgt_flat[:, None], axis=-1)[:, 0]
        return ref_logits, jnp.mean(lse - picked)

    ref_logits, ref_loss = ref_forward(model.token_embedding_table,
                                       idx.reshape(-1), targets.reshape(-1))

    assert logits.shape == (B * T, vocab_size)
    assert logits_nt.shape == (B, T, vocab_size)
    assert loss_nt is None
    assert jnp.allclose(logits, ref_logits, atol=1e-5, rtol=1e-5)
    assert jnp.allclose(logits_nt.reshape(B * T, vocab_size), ref_logits,
                        atol=1e-5, rtol=1e-5)
    assert jnp.allclose(loss, ref_loss, atol=1e-5, rtol=1e-5)

    # Multi-tile + row-padding path: N = 150 rows with a 64-row tile -> grid=3,
    # last tile padded (exercises the "parallel" grid axis, the in-kernel
    # padded-row masking, and the per-tile loss partial sums).
    n2 = 150
    idx2 = jax.random.randint(k_idx2, (n2,), 0, vocab_size, dtype=jnp.int32)
    tgt2 = jax.random.randint(k_tgt2, (n2,), 0, vocab_size, dtype=jnp.int32)
    logits2, loss2 = _bigram_forward(idx2, model._table_padded, vocab_size,
                                     tgt_flat=tgt2, tile_n=64)
    jax.block_until_ready((logits2, loss2))
    ref_logits2, ref_loss2 = ref_forward(model.token_embedding_table, idx2, tgt2)
    assert logits2.shape == (n2, vocab_size)
    assert jnp.allclose(logits2, ref_logits2, atol=1e-5, rtol=1e-5)
    assert jnp.allclose(loss2, ref_loss2, atol=1e-5, rtol=1e-5)

    print("KERNEL_OK")
</pallas_src>

<mosaic_0001>
module attributes {stable_mosaic.version = 11 : i64} {
  func.func @_embed_kernel(%arg0: i32, %arg1: memref<8x1xi32, #tpu.memory_space<vmem>>, %arg2: memref<128x128xf32, #tpu.memory_space<vmem>>, %arg3: memref<8x65xf32, #tpu.memory_space<vmem>>) attributes {dimension_semantics = [#tpu.dimension_semantics<parallel>], iteration_bounds = array<i64: 2>, scalar_prefetch = 0 : i64, scratch_operands = 0 : i64, tpu.core_type = #tpu.core_type<tc>, window_params = [{transform_indices = @transform_0, window_bounds = array<i64: 8, 1>}, {pipeline_mode = #tpu.pipeline_mode<synchronous>, transform_indices = @transform_1, window_bounds = array<i64: 128, 128>}, {transform_indices = @transform_2, window_bounds = array<i64: 8, 65>}]} {
    %c0 = arith.constant 0 : index
    %c0_0 = arith.constant 0 : index
    %0 = vector.load %arg1[%c0, %c0_0] : memref<8x1xi32, #tpu.memory_space<vmem>>, vector<8x1xi32>
    %1 = tpu.iota {dimensions = array<i32: 1>} : vector<8x128xi32>
    %2 = vector.broadcast %0 : vector<8x1xi32> to vector<8x128xi32>
    %3 = arith.cmpi eq, %1, %2 : vector<8x128xi32>
    %4 = arith.extui %3 : vector<8x128xi1> to vector<8x128xi32>
    %5 = arith.sitofp %4 : vector<8x128xi32> to vector<8x128xf32>
    %c0_1 = arith.constant 0 : index
    %c0_2 = arith.constant 0 : index
    %6 = vector.load %arg2[%c0_1, %c0_2] : memref<128x128xf32, #tpu.memory_space<vmem>>, vector<128x128xf32>
    %cst = arith.constant dense<0.000000e+00> : vector<8x128xf32>
    %7 = tpu.matmul %5, %6, %cst {dimension_numbers = #tpu.dot_dimension_numbers<[1], [0], [0], [1], [0, 0, 1, 1], [], []>} : vector<8x128xf32>, vector<128x128xf32>, vector<8x128xf32> -> vector<8x128xf32>
    %8 = vector.extract_strided_slice %7 {offsets = [0, 0], sizes = [8, 65], strides = [1, 1]} : vector<8x128xf32> to vector<8x65xf32>
    %c0_3 = arith.constant 0 : index
    %c0_4 = arith.constant 0 : index
    %9 = vector.load %arg3[%c0_3, %c0_4] : memref<8x65xf32, #tpu.memory_space<vmem>>, vector<8x65xf32>
    tpu.vector_store %arg3[%c0_3, %c0_4], %8 {strides = array<i32>} : memref<8x65xf32, #tpu.memory_space<vmem>>, vector<8x65xf32>,
    return
  }
  func.func @transform_0(%arg0: i32) -> (i32, i32) {
    %c0_i32 = arith.constant 0 : i32
    %c0_i32_0 = arith.constant 0 : i32
    return %arg0, %c0_i32 : i32, i32
  }
  func.func @transform_1(%arg0: i32) -> (i32, i32) {
    %c0_i32 = arith.constant 0 : i32
    %c0_i32_0 = arith.constant 0 : i32
    %c0_i32_1 = arith.constant 0 : i32
    return %c0_i32, %c0_i32_0 : i32, i32
  }
  func.func @transform_2(%arg0: i32) -> (i32, i32) {
    %c0_i32 = arith.constant 0 : i32
    %c0_i32_0 = arith.constant 0 : i32
    return %arg0, %c0_i32 : i32, i32
  }
}

</mosaic_0001>

<bundles_post_ra>
// kernel: tpu_custom_call.1
= control target key start
LH: loop header
LB: loop body
LE: loop exit
PB: predicated region body
PF: predicated region fallthrough
CT: control target
= control target key end

     0   :  { %7 = vsyncpa [#allocation3], 0  ;;  %s691_s0 = inlined_call_operand.vmem [shape: s32[16,1], index: 0, kind: input, shape index: {}]   ;;  %s692_s1 = inlined_call_operand.hbm [shape: f32[128,128], index: 1, kind: input, shape index: {}]   ;;  %s693_s2 = inlined_call_operand.hbm [shape: f32[16,65], index: 2, kind: output, shape index: {}]  }
   0x1   :  { %8 = vsyncpa [#allocation4], 0 }
   0x2   :  { %10 = vsyncpa [#allocation4 + $0x1], 0  ;;  %s574_s9 = smov 0   ;;  %s576_s10 = smov 0  }
   0x3   :  { %s578_s11 = smov 0   ;;  %s580_s12 = smov 0  }
   0x4 LB: > { %s595_s13 = sadd.s32 4294967295, %s549_s12   ;;  %s336_s14 = sadd.s32 4294967294, %s549_s12   ;;  %s549_s12 = sphi %s580_s12, %s701_s12   ;;  %s545_s11 = sphi %s578_s11, %s700_s11   ;;  %s541_s10 = sphi %s576_s10, %s699_s10   ;;  %s537_s9 = sphi %s574_s9, %s698_s9  }
   0x5   : > { %s599_s15 = sadd.s32 1, %s549_s12   ;;  %s70_s16 = sadd.s32 1, %s545_s11 }
   0x6   : > { %s67_s17 = ssub.s32 %s549_s12, %s599_s15  ;;  %p80_p0 = scmp.ne.s32.totalorder %s545_s11, %s541_s10 }
   0x7   : > { %p68_p1 = scmp.eq.s32.totalorder %s67_s17, 0  ;;  %p81_p2 = scmp.eq.s32.totalorder %s595_s13, 1 }
   0x8   : > { %p86_p3 = scmp.ne.s32.totalorder %s541_s10, %s537_s9  ;;  %p87_p4 = scmp.eq.s32.totalorder %s336_s14, 1 }
   0x9   : > { %s610_s18 = scalar_select %p68_p1, %s545_s11, %s70_s16  }
   0xa   : > { %p612_p5 = por %p81_p2, %p80_p0  ;;  %p616_p6 = por %p87_p4, %p86_p3 }
   0xb   : > { %p337_p7 = scmp.ge.s32.totalorder %s549_s12, 1  ;;  %p94_p8 = scmp.lt.s32.totalorder %s549_s12, 3 }
   0xc   : > { %s695_s20 = scalar_select %p616_p6, 1, 0 }
   0xd   : > { %p416_p9 = scmp.eq.s32.totalorder %s595_s13, 0  ;;  %p623_p10 = pnand %p337_p7, %p94_p8 }
   0xe   : > { %s551_s22 = smov [#allocation2]  }
   0xf   : > { %s106_s23 = sshll.u32 %s551_s22, 4  ;;  %p408_p11 = pneg %p623_p10  ;;  %s107_s23 = int_to_ptr.vmem [resolvable:$true] %s106_s23 }
  0x10   : > { %s470_s24 = scalar_lea.vmem %s107_s23, 2048  ;;  %p478_p3 = scmp.lt.s32.totalorder %s107_s23, %s107_s23 }
  0x11   : > { %p409_p12 = pnand %p416_p9, %p408_p11  ;;  %p471_p0 = scmp.ne.s32.totalorder %s107_s23, %s470_s24 }
  0x12   : > { %p479_p4 = scmp.lt.s32.totalorder %s470_s24, %s470_s24 }
  0x13   : > { %p461_p13 = pneg %p409_p12 }
  0x14   : > { %p480_p6 = por %p479_p4, %p478_p3 }
  0x15   : > { %p473_p1 = pnand %p471_p0, %p461_p13 }
  0x17   : > { %p474_p2 = pneg %p473_p1 }
  0x19   : > { %p481_p7 = pnand %p480_p6, %p474_p2 }
  0x1b   : > { %484 = shalt.err (!%p481_p7)
}
  0x1c   : > { %s552_s25 = smov 128   ;;  %s553_s26 = smov 8  }
  0x1d   : > { %411 = dma.hbm_to_vmem [thread:$0]  (!%p409_p12), %s692_s1, 2048, %s107_s23, [#allocation3], %s552_s25, %s552_s25, %s553_s26  }
  0x1e   : > { %129 = sbr.rel (%p623_p10) target bundleno = 375 (0x177), region = 28 }
  0x23   : > { %528 = dma.done.wait (%p416_p9), [#allocation3], 2048  }
  0x24   : > { %530 = vsyncadd (%p416_p9), [#allocation3], 4294965248  ;;  %p150_p8 = scmp.lt.s32.totalorder %s595_s13, 1  ;;  %v554_v0 = vmov 0   ;;  %v555_v1 = vmov 0.0   ;;  %vm556_vm0 = vmmov 0   ;;  %v155_v19 = vlaneseq }
  0x25   : > { %458 = vset.pattern.permute.xlu0 %v554_v0  ;;  %367 = vmatprep.subr.mxu0 %v555_v1  ;;  %v178_v3 = vld [vmem:[#allocation2 + $0x78] sm:$0xff]  ;;  %v177_v4 = vld [vmem:[#allocation2 + $0x70] sm:$0xff]  ;;  %v176_v5 = vld [vmem:[#allocation2 + $0x68] sm:$0xff]  ;;  %v557_v22 = vmov 1.0   ;;  %s147_s6 = sand.u32 1, %s541_s10   ;;  %s347_s8 = sshll.u32 %s595_s13, 7 }
  0x26   : > { %s151_s29 = scalar_select %p150_p8, %s595_s13, 1  ;;  %399 = vmatprep.mubr.msk.f32.mxu0 %vm556_vm0, %v555_v1  ;;  %368 = vmatpush3.msra.mxu0 %v178_v3  ;;  %v175_v6 = vld [vmem:[#allocation2 + $0x60] sm:$0xff]  ;;  %v174_v7 = vld [vmem:[#allocation2 + $0x58] sm:$0xff]  ;;  %v173_v8 = vld [vmem:[#allocation2 + $0x50] sm:$0xff]  ;;  %v156_v20 = vand.u32 127, %v155_v19  ;;  %vm249_vm2 = vcmask 531456  }
  0x27   : > { %369 = vmatprep.subr.mxu0 %v555_v1  ;;  %v172_v9 = vld [vmem:[#allocation2 + $0x48] sm:$0xff]  ;;  %v171_v10 = vld [vmem:[#allocation2 + $0x40] sm:$0xff]  ;;  %v170_v11 = vld [vmem:[#allocation2 + $0x38] sm:$0xff]  ;;  %s342_s7 = sshll.u32 %s147_s6, 3  ;;  %s650_s22 = scalar_lea.hbm %s693_s2, %s347_s8 }
  0x28   : > { %s343_s30 = sshll.u32 %s151_s29, 3  ;;  %370 = vmatpush3.msra.mxu0 %v177_v4  ;;  %v169_v12 = vld [vmem:[#allocation2 + $0x30] sm:$0xff]  ;;  %v168_v13 = vld [vmem:[#allocation2 + $0x28] sm:$0xff]  ;;  %v167_v14 = vld [vmem:[#allocation2 + $0x20] sm:$0xff]  ;;  %s149_s14 = scalar_lea.vmem [#allocation5], %s342_s7 }
  0x29   : > { %s153_s5 = scalar_lea.vmem %s691_s0, %s343_s30  ;;  %371 = vmatprep.subr.mxu0 %v555_v1  ;;  %v166_v15 = vld [vmem:[#allocation2 + $0x18] sm:$0xff]  ;;  %v165_v16 = vld [vmem:[#allocation2 + $0x10] sm:$0xff]  ;;  %v164_v17 = vld [vmem:[#allocation2 + $0x8] sm:$0xff]  ;;  %s265_s16 = sshll.u32 %s149_s14, 4  ;;  %s652_s16 = int_to_ptr.vmem [resolvable:$true] %s265_s16 }
  0x2a   : > { %v154_v2 = vld [vmem:[%s153_s5] sm:$0xff]  ;;  %372 = vmatpush3.msra.mxu0 %v176_v5  ;;  %s252_s23 = scalar_lea.sflag [#allocation4], %s147_s6  ;;  %s485_s24 = scalar_lea.vmem %s652_s16, 128 }
  0x2b   : > { %158 = vperm.xlu0 %458, %v154_v2   ;;  %373 = vmatprep.subr.mxu0 %v555_v1  ;;  %v163_v18 = vld [vmem:[#allocation2] sm:$0xff]  ;;  %p486_p6 = scmp.ne.s32.totalorder %s652_s16, %s485_s24  ;;  %s558_s13 = smov [#allocation5]  }
  0x2c   : > { %374 = vmatpush3.msra.mxu0 %v175_v6  ;;  %s489_s25 = sshll.u32 %s558_s13, 4  ;;  %s490_s25 = int_to_ptr.vmem [resolvable:$false] %s489_s25 }
  0x2d   : > { %375 = vmatprep.subr.mxu0 %v555_v1  ;;  %p487_p9 = pnand %p486_p6, %p612_p5  ;;  %s491_s26 = scalar_lea.vmem %s490_s25, 256 }
  0x2e   : > { %376 = vmatpush3.msra.mxu0 %v174_v7  ;;  %p492_p11 = scmp.lt.s32.totalorder %s652_s16, %s490_s25  ;;  %p493_p12 = scmp.lt.s32.totalorder %s491_s26, %s485_s24 }
  0x2f   : > { %377 = vmatprep.subr.mxu0 %v555_v1  ;;  %p488_p10 = pneg %p487_p9 }
  0x30   : > { %378 = vmatpush3.msra.mxu0 %v173_v8  ;;  %p494_p13 = por %p493_p12, %p492_p11 }
  0x31   : > { %379 = vmatprep.subr.mxu0 %v555_v1 }
  0x32   : > { %380 = vmatpush3.msra.mxu0 %v172_v9  ;;  %p495_p0 = pnand %p494_p13, %p488_p10 }
  0x33   : > { %381 = vmatprep.subr.mxu0 %v555_v1 }
  0x34   : > { %382 = vmatpush3.msra.mxu0 %v171_v10 }
  0x35   : > { %383 = vmatprep.subr.mxu0 %v555_v1 }
  0x36   : > { %384 = vmatpush3.msra.mxu0 %v170_v11 }
  0x37   : > { %385 = vmatprep.subr.mxu0 %v555_v1 }
  0x38   : > { %386 = vmatpush3.msra.mxu0 %v169_v12 }
  0x39   : > { %387 = vmatprep.subr.mxu0 %v555_v1 }
  0x3a   : > { %388 = vmatpush3.msra.mxu0 %v168_v13 }
  0x3b   : > { %389 = vmatprep.subr.mxu0 %v555_v1 }
  0x3c   : > { %390 = vmatpush3.msra.mxu0 %v167_v14 }
  0x3d   : > { %391 = vmatprep.subr.mxu0 %v555_v1 }
  0x3e   : > { %392 = vmatpush3.msra.mxu0 %v166_v15 }
  0x3f   : > { %393 = vmatprep.subr.mxu0 %v555_v1 }
  0x40   : > { %394 = vmatpush3.msra.mxu0 %v165_v16 }
  0x41   : > { %395 = vmatprep.subr.mxu0 %v555_v1 }
  0x42   : > { %396 = vmatpush3.msra.mxu0 %v164_v17 }
  0x43   : > { %397 = vmatprep.subr.mxu0 %v555_v1 }
  0x44   : > { %398 = vmatpush3.msra.mxu0 %v163_v18 }
  0xa6   : > { %v159_v21 = vpop.permute.xlu0 %158 }
  0xa7   : > { %vm160_vm1 = vcmp.eq.s32.totalorder %v156_v20, %v159_v21 }
  0xa8   : > { %400 = vmatmul.mubr.msk.f32.vlgmr.msra.gmra.mxu0 %vm160_vm1, %v557_v22 }
 0x168   : > { %v245_v23 = vpop.f32.mrf.mxu0 }
 0x169   : > { %250 = vst.msk [vmem:[%s149_s14] sm:$0xff] %vm249_vm2, %v245_v23 }
 0x16a   : > { %v401_v24 = vpop.f32.mrf.mxu0 }
 0x16b   : > { %498 = shalt.err (!%p495_p0)
}
 0x16c   : > { %s499_s27 = scalar_lea.hbm %s650_s22, 128  ;;  %s503_s30 = scalar_lea.hbm %s693_s2, 256 }
 0x16d   : > { %p500_p1 = scmp.ne.s32.totalorder %s650_s22, %s499_s27  ;;  %p504_p4 = scmp.lt.s32.totalorder %s650_s22, %s693_s2 }
 0x16e   : > { %p505_p7 = scmp.lt.s32.totalorder %s503_s30, %s499_s27 }
 0x16f   : > { %p501_p2 = pnand %p500_p1, %p612_p5 }
 0x170   : > { %p506_p8 = por %p505_p7, %p504_p4 }
 0x171   : > { %p502_p3 = pneg %p501_p2 }
 0x173   : > { %p507_p6 = pnand %p506_p8, %p502_p3 }
 0x175   : > { %510 = shalt.err (!%p507_p6)
}
 0x176   : > { %406 = dma.vmem_to_hbm [thread:$0]  (%p612_p5), %s652_s16, 128, %s650_s22, %s252_s23  }
 0x177 PF: > { %p418_p9 = scmp.ge.s32.totalorder %s549_s12, 2  ;;  %s277_s5 = sand.u32 1, %s537_s9  }
 0x178   : > { %p697_p10 = scmp.ne.s32.totalorder %s695_s20, 0  ;;  %s278_s6 = scalar_lea.sflag [#allocation4], %s277_s5 }
 0x17a   : > { %p413_p11 = pnand %p418_p9, %p697_p10 }
 0x17c   : > { %p414_p12 = pneg %p413_p11 }
 0x17e   : > { %532 = dma.done.wait (%p414_p12), %s278_s6, 128  }
 0x17f   : > { %534 = vsyncadd (%p414_p12), %s278_s6, 4294967168  ;;  %p13_p13 = scmp.ge.s32.totalorder %s599_s15, 4   ;;  %s698_s9 = smov %s541_s10 }
 0x180   : > { %s699_s10 = smov %s545_s11  ;;  %s700_s11 = smov %s610_s18 }
 0x181   : > { %s701_s12 = smov %s599_s15  ;;  %15 = sbr.rel (!%p13_p13) target bundleno = 4 (0x4), region = 68 }
 0x186   :  { %283 = vsyncpa [#allocation3], 1 }
 0x187   :  { %285 = vsyncpa [#allocation3 + $0x1], 1 }
 0x188   :  { %286 = vsyncpa [#allocation4], 1 }
 0x189   :  { %288 = vsyncpa [#allocation4 + $0x1], 1 }

</bundles_post_ra>
